<compile_context>
chip_gen: v7x
topology: tpu7x:2x2x1
jax: 0.10.0
libtpu: 0.0.40
codegen_flags: <defaults>
</compile_context>

<pallas_src>
import functools

import jax
import jax.numpy as jnp
from jax.experimental import pallas as pl
from jax.experimental.pallas import tpu as pltpu


def _upsample_conv_relu_kernel(x_ref, rw_ref, rh_ref, g_ref, b_ref, o_ref, *,
                               C_in, H, W, C_out, K, s):
    """One image per grid step: in-VMEM nearest upsample + pad + conv + bias + ReLU.

    x_ref : (1, C_in*H, W)              original image, NCHW order flattened (no transpose)
    rw_ref: (W, Wp_pad)                 width nearest-upsample + zero-pad 0/1 matrix
    rh_ref: (C_in*Hp, C_in*H)           block-diagonal height nearest-upsample + zero-pad matrix
    g_ref : (K*C_in, Wp_pad, Wo*C_out)  banded conv-weight blocks
    b_ref : (1, Wo*C_out)               bias replicated per output column
    o_ref : (1, Ho, Wo*C_out)           lane-dense output slab
    """
    p = K // 2
    Hs = H * s
    Hp = Hs + 2 * p
    Ho = Hp - K + 1
    Wo = W * s + 2 * p - K + 1

    x2 = x_ref[0].astype(jnp.float32)                                    # (C_in*H, W)

    # nearest upsample + zero pad, entirely in VMEM, via constant 0/1 matmuls
    xw = jnp.dot(x2, rw_ref[...], preferred_element_type=jnp.float32)    # (C_in*H, Wp_pad)
    xhw = jnp.dot(rh_ref[...], xw, preferred_element_type=jnp.float32)   # (C_in*Hp, Wp_pad)

    # banded-matmul convolution: accumulate over (dy, c); contraction dim = Wp_pad
    acc = jnp.zeros((Ho, Wo * C_out), jnp.float32)
    for dy in range(K):                     # static unroll: K * C_in dense matmuls
        for c in range(C_in):
            rows = xhw[c * Hp + dy: c * Hp + dy + Ho, :]                 # (Ho, Wp_pad)
            acc = acc + jnp.dot(rows, g_ref[dy * C_in + c],
                                preferred_element_type=jnp.float32)      # (Ho, Wo*C_out)

    out = jnp.maximum(acc + b_ref[...], 0.0)                             # bias + ReLU (f32 VPU)
    o_ref[0] = out.astype(o_ref.dtype)


def upsample_block(image_nchw, weight, bias, *, scale_factor=2.0):
    """Equivalent of UpsampleBlock.forward(image) for NCHW input.

    weight: (K, K, C_in, C_out) (HWIO), bias: (C_out,).
    """
    N, C_in, H, W = image_nchw.shape
    K = weight.shape[0]
    C_out = weight.shape[-1]

    s = int(round(float(scale_factor)))
    if s < 1 or float(s) != float(scale_factor):
        raise ValueError("only positive integer scale_factor is supported (nearest upsample)")

    p = K // 2
    Hs, Ws = H * s, W * s
    Hp, Wp = Hs + 2 * p, Ws + 2 * p
    Ho, Wo = Hp - K + 1, Wp - K + 1             # == Hs, Ws for odd K
    Wp_pad = ((Wp + 7) // 8) * 8                # pad contraction dim to a sublane multiple

    f32 = jnp.float32
    weight = weight.astype(f32)
    bias = bias.astype(f32)

    # ---- tiny constant operators (built once, grid-invariant inputs) ----
    # width nearest-upsample + zero-pad:  r_w[x0, v] = 1 iff v maps to source column x0
    v = jnp.arange(Wp_pad)
    in_w = (v >= p) & (v < p + Ws)
    src_w = jnp.clip((v - p) // s, 0, W - 1)
    r_w = ((src_w[None, :] == jnp.arange(W)[:, None]) & in_w[None, :]).astype(f32)   # (W, Wp_pad)

    # height nearest-upsample + zero-pad, block-diagonal over channels
    u = jnp.arange(Hp)
    in_h = (u >= p) & (u < p + Hs)
    src_h = jnp.clip((u - p) // s, 0, H - 1)
    r_h = ((src_h[:, None] == jnp.arange(H)[None, :]) & in_h[:, None]).astype(f32)   # (Hp, H)
    r_hblk = jnp.kron(jnp.eye(C_in, dtype=f32), r_h)                                  # (C_in*Hp, C_in*H)

    # banded conv-weight blocks: g[dy*C_in + c, v, x*C_out + co] = w[dy, v - x, c, co] (0 outside band)
    dx = v[:, None] - jnp.arange(Wo)[None, :]                       # (Wp_pad, Wo)
    valid = (dx >= 0) & (dx < K) & (v[:, None] < Wp)
    w_g = weight[:, jnp.clip(dx, 0, K - 1), :, :]                   # (K, Wp_pad, Wo, C_in, C_out)
    w_g = jnp.where(valid[None, :, :, None, None], w_g, 0.0)
    w_g = jnp.transpose(w_g, (0, 3, 1, 2, 4))                       # (K, C_in, Wp_pad, Wo, C_out)
    g = w_g.reshape(K * C_in, Wp_pad, Wo * C_out)

    b_row = jnp.tile(bias, (Wo,)).reshape(1, Wo * C_out)            # bias hoisted to a lane row

    x2 = image_nchw.reshape(N, C_in * H, W)    # NCHW passed through; free reshape, no transpose

    kern = functools.partial(_upsample_conv_relu_kernel,
                             C_in=C_in, H=H, W=W, C_out=C_out, K=K, s=s)

    out_slab = pl.pallas_call(
        kern,
        out_shape=jax.ShapeDtypeStruct((N, Ho, Wo * C_out), image_nchw.dtype),
        grid_spec=pltpu.PrefetchScalarGridSpec(
            num_scalar_prefetch=0,
            grid=(N,),
            in_specs=[
                pl.BlockSpec((1, C_in * H, W), lambda n: (n, 0, 0)),
                pl.BlockSpec((W, Wp_pad), lambda n: (0, 0)),
                pl.BlockSpec((C_in * Hp, C_in * H), lambda n: (0, 0)),
                pl.BlockSpec((K * C_in, Wp_pad, Wo * C_out), lambda n: (0, 0, 0)),
                pl.BlockSpec((1, Wo * C_out), lambda n: (0, 0)),
            ],
            out_specs=pl.BlockSpec((1, Ho, Wo * C_out), lambda n: (n, 0, 0)),
        ),
        compiler_params=pltpu.CompilerParams(dimension_semantics=("parallel",)),
    )(x2, r_w, r_hblk, g, b_row)

    # lane-dense slab -> NCHW: single small fused reshape+transpose
    return jnp.transpose(out_slab.reshape(N, Ho, Wo, C_out), (0, 3, 1, 2))


def _reference(image_nchw, weight, bias, *, scale_factor=2.0):
    """Pure-JAX reference: nearest upsample + conv2d(same) + bias + ReLU."""
    s = int(scale_factor)
    x = jnp.repeat(jnp.repeat(image_nchw, s, axis=2), s, axis=3)
    w_oihw = jnp.transpose(weight, (3, 2, 0, 1))        # (K,K,Cin,Cout) -> OIHW
    K = weight.shape[0]
    p = K // 2
    y = jax.lax.conv_general_dilated(
        x.astype(jnp.float32), w_oihw.astype(jnp.float32),
        window_strides=(1, 1), padding=((p, p), (p, p)),
        dimension_numbers=("NCHW", "OIHW", "NCHW"),
    )
    y = y + bias.astype(jnp.float32)[None, :, None, None]
    return jnp.maximum(y, 0.0).astype(image_nchw.dtype)


if __name__ == "__main__":
    # Module config: UpsampleBlock(in_channels=4, out_channels=8, kernel_size=3, scale_factor=2)
    in_channels, out_channels, kernel_size, scale_factor = 4, 8, 3, 2.0
    batch, spatial = 2, 16

    key = jax.random.PRNGKey(0)
    k_img, k_w, k_b = jax.random.split(key, 3)

    image = jax.random.normal(k_img, (batch, in_channels, spatial, spatial), jnp.float32)
    weight = jax.random.normal(k_w, (kernel_size, kernel_size, in_channels, out_channels),
                               jnp.float32) * 0.1
    bias = jax.random.normal(k_b, (out_channels,), jnp.float32) * 0.1

    out = upsample_block(image, weight, bias, scale_factor=scale_factor)
    out = jax.block_until_ready(out)

    ref = jax.block_until_ready(_reference(image, weight, bias, scale_factor=scale_factor))
    assert out.shape == (batch, out_channels, spatial * 2, spatial * 2), out.shape
    assert jnp.allclose(out, ref, atol=1e-4, rtol=1e-4), float(jnp.max(jnp.abs(out - ref)))

    print("KERNEL_OK")
</pallas_src>

<mosaic_0001>
module attributes {stable_mosaic.version = 11 : i64} {
  func.func @_upsample_conv_relu_kernel(%arg0: i32, %arg1: memref<1x64x16xf32, #tpu.memory_space<vmem>>, %arg2: memref<16x40xf32, #tpu.memory_space<vmem>>, %arg3: memref<136x64xf32, #tpu.memory_space<vmem>>, %arg4: memref<12x40x256xf32, #tpu.memory_space<vmem>>, %arg5: memref<1x256xf32, #tpu.memory_space<vmem>>, %arg6: memref<1x32x256xf32, #tpu.memory_space<vmem>>) attributes {dimension_semantics = [#tpu.dimension_semantics<parallel>], iteration_bounds = array<i64: 2>, scalar_prefetch = 0 : i64, scratch_operands = 0 : i64, tpu.core_type = #tpu.core_type<tc>, window_params = [{transform_indices = @transform_0, window_bounds = array<i64: 1, 64, 16>}, {pipeline_mode = #tpu.pipeline_mode<synchronous>, transform_indices = @transform_1, window_bounds = array<i64: 16, 40>}, {pipeline_mode = #tpu.pipeline_mode<synchronous>, transform_indices = @transform_2, window_bounds = array<i64: 136, 64>}, {pipeline_mode = #tpu.pipeline_mode<synchronous>, transform_indices = @transform_3, window_bounds = array<i64: 12, 40, 256>}, {pipeline_mode = #tpu.pipeline_mode<synchronous>, transform_indices = @transform_4, window_bounds = array<i64: 1, 256>}, {transform_indices = @transform_5, window_bounds = array<i64: 1, 32, 256>}]} {
    %c0 = arith.constant 0 : index
    %c0_0 = arith.constant 0 : index
    %c0_1 = arith.constant 0 : index
    %0 = vector.load %arg1[%c0, %c0_0, %c0_1] : memref<1x64x16xf32, #tpu.memory_space<vmem>>, vector<1x64x16xf32>
    %1 = vector.shape_cast %0 : vector<1x64x16xf32> to vector<64x16xf32>
    %c0_2 = arith.constant 0 : index
    %c0_3 = arith.constant 0 : index
    %2 = vector.load %arg2[%c0_2, %c0_3] : memref<16x40xf32, #tpu.memory_space<vmem>>, vector<16x40xf32>
    %cst = arith.constant dense<0.000000e+00> : vector<64x40xf32>
    %3 = tpu.matmul %1, %2, %cst {dimension_numbers = #tpu.dot_dimension_numbers<[1], [0], [0], [1], [0, 0, 1, 1], [], []>} : vector<64x16xf32>, vector<16x40xf32>, vector<64x40xf32> -> vector<64x40xf32>
    %c0_4 = arith.constant 0 : index
    %c0_5 = arith.constant 0 : index
    %4 = vector.load %arg3[%c0_4, %c0_5] : memref<136x64xf32, #tpu.memory_space<vmem>>, vector<136x64xf32>
    %cst_6 = arith.constant dense<0.000000e+00> : vector<136x40xf32>
    %5 = tpu.matmul %4, %3, %cst_6 {dimension_numbers = #tpu.dot_dimension_numbers<[1], [0], [0], [1], [0, 0, 1, 1], [], []>} : vector<136x64xf32>, vector<64x40xf32>, vector<136x40xf32> -> vector<136x40xf32>
    %cst_7 = arith.constant 0.000000e+00 : f32
    %6 = vector.broadcast %cst_7 : f32 to vector<32x256xf32>
    %7 = vector.extract_strided_slice %5 {offsets = [0, 0], sizes = [32, 40], strides = [1, 1]} : vector<136x40xf32> to vector<32x40xf32>
    %c0_8 = arith.constant 0 : index
    %c0_9 = arith.constant 0 : index
    %c0_10 = arith.constant 0 : index
    %8 = vector.load %arg4[%c0_8, %c0_9, %c0_10] : memref<12x40x256xf32, #tpu.memory_space<vmem>>, vector<1x40x256xf32>
    %9 = vector.shape_cast %8 : vector<1x40x256xf32> to vector<40x256xf32>
    %cst_11 = arith.constant dense<0.000000e+00> : vector<32x256xf32>
    %10 = tpu.matmul %7, %9, %cst_11 {dimension_numbers = #tpu.dot_dimension_numbers<[1], [0], [0], [1], [0, 0, 1, 1], [], []>} : vector<32x40xf32>, vector<40x256xf32>, vector<32x256xf32> -> vector<32x256xf32>
    %11 = arith.addf %6, %10 : vector<32x256xf32>
    %12 = vector.extract_strided_slice %5 {offsets = [34, 0], sizes = [32, 40], strides = [1, 1]} : vector<136x40xf32> to vector<32x40xf32>
    %c1 = arith.constant 1 : index
    %c0_12 = arith.constant 0 : index
    %c0_13 = arith.constant 0 : index
    %13 = vector.load %arg4[%c1, %c0_12, %c0_13] : memref<12x40x256xf32, #tpu.memory_space<vmem>>, vector<1x40x256xf32>
    %14 = vector.shape_cast %13 : vector<1x40x256xf32> to vector<40x256xf32>
    %cst_14 = arith.constant dense<0.000000e+00> : vector<32x256xf32>
    %15 = tpu.matmul %12, %14, %cst_14 {dimension_numbers = #tpu.dot_dimension_numbers<[1], [0], [0], [1], [0, 0, 1, 1], [], []>} : vector<32x40xf32>, vector<40x256xf32>, vector<32x256xf32> -> vector<32x256xf32>
    %16 = arith.addf %11, %15 : vector<32x256xf32>
    %17 = vector.extract_strided_slice %5 {offsets = [68, 0], sizes = [32, 40], strides = [1, 1]} : vector<136x40xf32> to vector<32x40xf32>
    %c2 = arith.constant 2 : index
    %c0_15 = arith.constant 0 : index
    %c0_16 = arith.constant 0 : index
    %18 = vector.load %arg4[%c2, %c0_15, %c0_16] : memref<12x40x256xf32, #tpu.memory_space<vmem>>, vector<1x40x256xf32>
    %19 = vector.shape_cast %18 : vector<1x40x256xf32> to vector<40x256xf32>
    %cst_17 = arith.constant dense<0.000000e+00> : vector<32x256xf32>
    %20 = tpu.matmul %17, %19, %cst_17 {dimension_numbers = #tpu.dot_dimension_numbers<[1], [0], [0], [1], [0, 0, 1, 1], [], []>} : vector<32x40xf32>, vector<40x256xf32>, vector<32x256xf32> -> vector<32x256xf32>
    %21 = arith.addf %16, %20 : vector<32x256xf32>
    %22 = vector.extract_strided_slice %5 {offsets = [102, 0], sizes = [32, 40], strides = [1, 1]} : vector<136x40xf32> to vector<32x40xf32>
    %c3 = arith.constant 3 : index
    %c0_18 = arith.constant 0 : index
    %c0_19 = arith.constant 0 : index
    %23 = vector.load %arg4[%c3, %c0_18, %c0_19] : memref<12x40x256xf32, #tpu.memory_space<vmem>>, vector<1x40x256xf32>
    %24 = vector.shape_cast %23 : vector<1x40x256xf32> to vector<40x256xf32>
    %cst_20 = arith.constant dense<0.000000e+00> : vector<32x256xf32>
    %25 = tpu.matmul %22, %24, %cst_20 {dimension_numbers = #tpu.dot_dimension_numbers<[1], [0], [0], [1], [0, 0, 1, 1], [], []>} : vector<32x40xf32>, vector<40x256xf32>, vector<32x256xf32> -> vector<32x256xf32>
    %26 = arith.addf %21, %25 : vector<32x256xf32>
    %27 = vector.extract_strided_slice %5 {offsets = [1, 0], sizes = [32, 40], strides = [1, 1]} : vector<136x40xf32> to vector<32x40xf32>
    %c4 = arith.constant 4 : index
    %c0_21 = arith.constant 0 : index
    %c0_22 = arith.constant 0 : index
    %28 = vector.load %arg4[%c4, %c0_21, %c0_22] : memref<12x40x256xf32, #tpu.memory_space<vmem>>, vector<1x40x256xf32>
    %29 = vector.shape_cast %28 : vector<1x40x256xf32> to vector<40x256xf32>
    %cst_23 = arith.constant dense<0.000000e+00> : vector<32x256xf32>
    %30 = tpu.matmul %27, %29, %cst_23 {dimension_numbers = #tpu.dot_dimension_numbers<[1], [0], [0], [1], [0, 0, 1, 1], [], []>} : vector<32x40xf32>, vector<40x256xf32>, vector<32x256xf32> -> vector<32x256xf32>
    %31 = arith.addf %26, %30 : vector<32x256xf32>
    %32 = vector.extract_strided_slice %5 {offsets = [35, 0], sizes = [32, 40], strides = [1, 1]} : vector<136x40xf32> to vector<32x40xf32>
    %c5 = arith.constant 5 : index
    %c0_24 = arith.constant 0 : index
    %c0_25 = arith.constant 0 : index
    %33 = vector.load %arg4[%c5, %c0_24, %c0_25] : memref<12x40x256xf32, #tpu.memory_space<vmem>>, vector<1x40x256xf32>
    %34 = vector.shape_cast %33 : vector<1x40x256xf32> to vector<40x256xf32>
    %cst_26 = arith.constant dense<0.000000e+00> : vector<32x256xf32>
    %35 = tpu.matmul %32, %34, %cst_26 {dimension_numbers = #tpu.dot_dimension_numbers<[1], [0], [0], [1], [0, 0, 1, 1], [], []>} : vector<32x40xf32>, vector<40x256xf32>, vector<32x256xf32> -> vector<32x256xf32>
    %36 = arith.addf %31, %35 : vector<32x256xf32>
    %37 = vector.extract_strided_slice %5 {offsets = [69, 0], sizes = [32, 40], strides = [1, 1]} : vector<136x40xf32> to vector<32x40xf32>
    %c6 = arith.constant 6 : index
    %c0_27 = arith.constant 0 : index
    %c0_28 = arith.constant 0 : index
    %38 = vector.load %arg4[%c6, %c0_27, %c0_28] : memref<12x40x256xf32, #tpu.memory_space<vmem>>, vector<1x40x256xf32>
    %39 = vector.shape_cast %38 : vector<1x40x256xf32> to vector<40x256xf32>
    %cst_29 = arith.constant dense<0.000000e+00> : vector<32x256xf32>
    %40 = tpu.matmul %37, %39, %cst_29 {dimension_numbers = #tpu.dot_dimension_numbers<[1], [0], [0], [1], [0, 0, 1, 1], [], []>} : vector<32x40xf32>, vector<40x256xf32>, vector<32x256xf32> -> vector<32x256xf32>
    %41 = arith.addf %36, %40 : vector<32x256xf32>
    %42 = vector.extract_strided_slice %5 {offsets = [103, 0], sizes = [32, 40], strides = [1, 1]} : vector<136x40xf32> to vector<32x40xf32>
    %c7 = arith.constant 7 : index
    %c0_30 = arith.constant 0 : index
    %c0_31 = arith.constant 0 : index
    %43 = vector.load %arg4[%c7, %c0_30, %c0_31] : memref<12x40x256xf32, #tpu.memory_space<vmem>>, vector<1x40x256xf32>
    %44 = vector.shape_cast %43 : vector<1x40x256xf32> to vector<40x256xf32>
    %cst_32 = arith.constant dense<0.000000e+00> : vector<32x256xf32>
    %45 = tpu.matmul %42, %44, %cst_32 {dimension_numbers = #tpu.dot_dimension_numbers<[1], [0], [0], [1], [0, 0, 1, 1], [], []>} : vector<32x40xf32>, vector<40x256xf32>, vector<32x256xf32> -> vector<32x256xf32>
    %46 = arith.addf %41, %45 : vector<32x256xf32>
    %47 = vector.extract_strided_slice %5 {offsets = [2, 0], sizes = [32, 40], strides = [1, 1]} : vector<136x40xf32> to vector<32x40xf32>
    %c8 = arith.constant 8 : index
    %c0_33 = arith.constant 0 : index
    %c0_34 = arith.constant 0 : index
    %48 = vector.load %arg4[%c8, %c0_33, %c0_34] : memref<12x40x256xf32, #tpu.memory_space<vmem>>, vector<1x40x256xf32>
    %49 = vector.shape_cast %48 : vector<1x40x256xf32> to vector<40x256xf32>
    %cst_35 = arith.constant dense<0.000000e+00> : vector<32x256xf32>
    %50 = tpu.matmul %47, %49, %cst_35 {dimension_numbers = #tpu.dot_dimension_numbers<[1], [0], [0], [1], [0, 0, 1, 1], [], []>} : vector<32x40xf32>, vector<40x256xf32>, vector<32x256xf32> -> vector<32x256xf32>
    %51 = arith.addf %46, %50 : vector<32x256xf32>
    %52 = vector.extract_strided_slice %5 {offsets = [36, 0], sizes = [32, 40], strides = [1, 1]} : vector<136x40xf32> to vector<32x40xf32>
    %c9 = arith.constant 9 : index
    %c0_36 = arith.constant 0 : index
    %c0_37 = arith.constant 0 : index
    %53 = vector.load %arg4[%c9, %c0_36, %c0_37] : memref<12x40x256xf32, #tpu.memory_space<vmem>>, vector<1x40x256xf32>
    %54 = vector.shape_cast %53 : vector<1x40x256xf32> to vector<40x256xf32>
    %cst_38 = arith.constant dense<0.000000e+00> : vector<32x256xf32>
    %55 = tpu.matmul %52, %54, %cst_38 {dimension_numbers = #tpu.dot_dimension_numbers<[1], [0], [0], [1], [0, 0, 1, 1], [], []>} : vector<32x40xf32>, vector<40x256xf32>, vector<32x256xf32> -> vector<32x256xf32>
    %56 = arith.addf %51, %55 : vector<32x256xf32>
    %57 = vector.extract_strided_slice %5 {offsets = [70, 0], sizes = [32, 40], strides = [1, 1]} : vector<136x40xf32> to vector<32x40xf32>
    %c10 = arith.constant 10 : index
    %c0_39 = arith.constant 0 : index
    %c0_40 = arith.constant 0 : index
    %58 = vector.load %arg4[%c10, %c0_39, %c0_40] : memref<12x40x256xf32, #tpu.memory_space<vmem>>, vector<1x40x256xf32>
    %59 = vector.shape_cast %58 : vector<1x40x256xf32> to vector<40x256xf32>
    %cst_41 = arith.constant dense<0.000000e+00> : vector<32x256xf32>
    %60 = tpu.matmul %57, %59, %cst_41 {dimension_numbers = #tpu.dot_dimension_numbers<[1], [0], [0], [1], [0, 0, 1, 1], [], []>} : vector<32x40xf32>, vector<40x256xf32>, vector<32x256xf32> -> vector<32x256xf32>
    %61 = arith.addf %56, %60 : vector<32x256xf32>
    %62 = vector.extract_strided_slice %5 {offsets = [104, 0], sizes = [32, 40], strides = [1, 1]} : vector<136x40xf32> to vector<32x40xf32>
    %c11 = arith.constant 11 : index
    %c0_42 = arith.constant 0 : index
    %c0_43 = arith.constant 0 : index
    %63 = vector.load %arg4[%c11, %c0_42, %c0_43] : memref<12x40x256xf32, #tpu.memory_space<vmem>>, vector<1x40x256xf32>
    %64 = vector.shape_cast %63 : vector<1x40x256xf32> to vector<40x256xf32>
    %cst_44 = arith.constant dense<0.000000e+00> : vector<32x256xf32>
    %65 = tpu.matmul %62, %64, %cst_44 {dimension_numbers = #tpu.dot_dimension_numbers<[1], [0], [0], [1], [0, 0, 1, 1], [], []>} : vector<32x40xf32>, vector<40x256xf32>, vector<32x256xf32> -> vector<32x256xf32>
    %66 = arith.addf %61, %65 : vector<32x256xf32>
    %c0_45 = arith.constant 0 : index
    %c0_46 = arith.constant 0 : index
    %67 = vector.load %arg5[%c0_45, %c0_46] : memref<1x256xf32, #tpu.memory_space<vmem>>, vector<1x256xf32>
    %68 = vector.broadcast %67 : vector<1x256xf32> to vector<32x256xf32>
    %69 = arith.addf %66, %68 : vector<32x256xf32>
    %cst_47 = arith.constant 0.000000e+00 : f32
    %70 = vector.broadcast %cst_47 : f32 to vector<32x256xf32>
    %71 = arith.maximumf %69, %70 : vector<32x256xf32>
    %c0_48 = arith.constant 0 : index
    %c0_49 = arith.constant 0 : index
    %c0_50 = arith.constant 0 : index
    %72 = vector.load %arg6[%c0_48, %c0_49, %c0_50] : memref<1x32x256xf32, #tpu.memory_space<vmem>>, vector<1x32x256xf32>
    %73 = vector.shape_cast %72 : vector<1x32x256xf32> to vector<32x256xf32>
    %74 = vector.shape_cast %71 : vector<32x256xf32> to vector<1x32x256xf32>
    tpu.vector_store %arg6[%c0_48, %c0_49, %c0_50], %74 {strides = array<i32>} : memref<1x32x256xf32, #tpu.memory_space<vmem>>, vector<1x32x256xf32>,
    return
  }
  func.func @transform_0(%arg0: i32) -> (i32, i32, i32) {
    %c0_i32 = arith.constant 0 : i32
    %c0_i32_0 = arith.constant 0 : i32
    %c0_i32_1 = arith.constant 0 : i32
    return %arg0, %c0_i32, %c0_i32_0 : i32, i32, i32
  }
  func.func @transform_1(%arg0: i32) -> (i32, i32) {
    %c0_i32 = arith.constant 0 : i32
    %c0_i32_0 = arith.constant 0 : i32
    %c0_i32_1 = arith.constant 0 : i32
    return %c0_i32, %c0_i32_0 : i32, i32
  }
  func.func @transform_2(%arg0: i32) -> (i32, i32) {
    %c0_i32 = arith.constant 0 : i32
    %c0_i32_0 = arith.constant 0 : i32
    %c0_i32_1 = arith.constant 0 : i32
    return %c0_i32, %c0_i32_0 : i32, i32
  }
  func.func @transform_3(%arg0: i32) -> (i32, i32, i32) {
    %c0_i32 = arith.constant 0 : i32
    %c0_i32_0 = arith.constant 0 : i32
    %c0_i32_1 = arith.constant 0 : i32
    %c0_i32_2 = arith.constant 0 : i32
    return %c0_i32, %c0_i32_0, %c0_i32_1 : i32, i32, i32
  }
  func.func @transform_4(%arg0: i32) -> (i32, i32) {
    %c0_i32 = arith.constant 0 : i32
    %c0_i32_0 = arith.constant 0 : i32
    %c0_i32_1 = arith.constant 0 : i32
    return %c0_i32, %c0_i32_0 : i32, i32
  }
  func.func @transform_5(%arg0: i32) -> (i32, i32, i32) {
    %c0_i32 = arith.constant 0 : i32
    %c0_i32_0 = arith.constant 0 : i32
    %c0_i32_1 = arith.constant 0 : i32
    return %arg0, %c0_i32, %c0_i32_0 : i32, i32, i32
  }
}

</mosaic_0001>

<bundles_post_ra>
// kernel: tpu_custom_call.1
= control target key start
LH: loop header
LB: loop body
LE: loop exit
PB: predicated region body
PF: predicated region fallthrough
CT: control target
= control target key end

     0   :  { %10 = vsyncpa [#allocation3], 0  ;;  %s3306_s0 = inlined_call_operand.vmem [shape: f32[2,64,16], index: 0, kind: input, shape index: {}]   ;;  %s3307_s1 = inlined_call_operand.vmem [shape: f32[16,40], index: 1, kind: input, shape index: {}]   ;;  %s3308_s2 = inlined_call_operand.vmem [shape: f32[136,64], index: 2, kind: input, shape index: {}]   ;;  %s3309_s3 = inlined_call_operand.hbm [shape: f32[12,40,256], index: 3, kind: input, shape index: {}]   ;;  %s3310_s4 = inlined_call_operand.vmem [shape: f32[1,256], index: 4, kind: input, shape index: {}]   ;;  %s3311_s5 = inlined_call_operand.hbm [shape: f32[2,32,256], index: 5, kind: output, shape index: {}]  }
   0x1   :  { %11 = vsyncpa [#allocation4], 0 }
   0x2   :  { %13 = vsyncpa [#allocation4 + $0x1], 0  ;;  %s2807_s18 = smov 0   ;;  %s2809_s19 = smov 0  }
   0x3   :  { %s2811_s20 = smov 0   ;;  %s2813_s21 = smov 0  }
   0x4 LB: > { %s2828_s22 = sadd.s32 4294967295, %s2766_s21   ;;  %s2208_s23 = sadd.s32 4294967294, %s2766_s21   ;;  %s2766_s21 = sphi %s2813_s21, %s3327_s21   ;;  %s2762_s20 = sphi %s2811_s20, %s3326_s20   ;;  %s2758_s19 = sphi %s2809_s19, %s3325_s19   ;;  %s2754_s18 = sphi %s2807_s18, %s3324_s18  }
   0x5   : > { %s2832_s24 = sadd.s32 1, %s2766_s21   ;;  %s136_s25 = sadd.s32 1, %s2762_s20 }
   0x6   : > { %s133_s26 = ssub.s32 %s2766_s21, %s2832_s24  ;;  %p146_p0 = scmp.ne.s32.totalorder %s2762_s20, %s2758_s19 }
   0x7   : > { %p134_p1 = scmp.eq.s32.totalorder %s133_s26, 0  ;;  %p147_p2 = scmp.eq.s32.totalorder %s2828_s22, 1 }
   0x8   : > { %p152_p3 = scmp.ne.s32.totalorder %s2758_s19, %s2754_s18  ;;  %p153_p4 = scmp.eq.s32.totalorder %s2208_s23, 1 }
   0x9   : > { %s2843_s27 = scalar_select %p134_p1, %s2762_s20, %s136_s25  }
   0xa   : > { %p2845_p5 = por %p147_p2, %p146_p0  ;;  %p2849_p6 = por %p153_p4, %p152_p3 }
   0xb   : > { %p2209_p7 = scmp.ge.s32.totalorder %s2766_s21, 1  ;;  %p160_p8 = scmp.lt.s32.totalorder %s2766_s21, 3 }
   0xc   : > { %s3315_s28 = scalar_select %p2845_p5, 1, 0 }
   0xd   : > { %s3316_s29 = scalar_select %p2849_p6, 1, 0 }
   0xe   : > { %p3312_p9 = scmp.eq.s32.totalorder %s2828_s22, 0  ;;  %p2856_p10 = pnand %p2209_p7, %p160_p8 }
   0xf   : > { %s2768_s6 = smov [#allocation2]   ;;  %s2672_s11 = scalar_lea.hbm %s3309_s3, 15360 }
  0x10   : > { %s3317_s30 = scalar_select %p2856_p10, 1, 0 }
  0x11   : > { %s178_s7 = sshll.u32 %s2768_s6, 4  ;;  %p2621_p11 = pneg %p2856_p10  ;;  %s179_s7 = int_to_ptr.vmem [resolvable:$true] %s178_s7 }
  0x12   : > { %p2673_p13 = scmp.ne.s32.totalorder %s3309_s3, %s2672_s11  ;;  %p2679_p3 = scmp.lt.u32.totalorder %s2672_s11, %s3309_s3 }
  0x13   : > { %p2864_p12 = pnand %p3312_p9, %p2621_p11 }
  0x15   : > { %p2674_p0 = pneg %p2864_p12 }
  0x17   : > { %p2675_p1 = pnand %p2674_p0, %p2673_p13 }
  0x19   : > { %p2676_p2 = pneg %p2675_p1 }
  0x1b   : > { %p2681_p4 = pnand %p2679_p3, %p2676_p2 }
  0x1d   : > { %2684 = shalt.err (!%p2681_p4)
}
  0x1e   : > { %s2685_s16 = scalar_lea.vmem %s179_s7, 15360  ;;  %p2693_p9 = scmp.lt.s32.totalorder %s179_s7, %s179_s7 }
  0x1f   : > { %p2686_p7 = scmp.ne.s32.totalorder %s179_s7, %s2685_s16  ;;  %p2694_p6 = scmp.lt.s32.totalorder %s2685_s16, %s2685_s16 }
  0x21   : > { %p2688_p8 = pnand %p2686_p7, %p2674_p0  ;;  %p2695_p5 = por %p2694_p6, %p2693_p9 }
  0x23   : > { %p2689_p11 = pneg %p2688_p8 }
  0x25   : > { %p2696_p10 = pnand %p2695_p5, %p2689_p11 }
  0x27   : > { %2699 = shalt.err (!%p2696_p10)
}
  0x28   : > { %s2769_s17 = smov 256   ;;  %s2770_s23 = smov 16  }
  0x29   : > { %2624 = dma.hbm_to_vmem [thread:$0]  (!%p2864_p12), %s3309_s3, 15360, %s179_s7, [#allocation3], %s2769_s17, %s2769_s17, %s2770_s23  }
  0x2a   : > { %p3319_p13 = scmp.ne.s32.totalorder %s3317_s30, 0 }
  0x2b   : > { %p3320_p1 = scmp.eq.s32.totalorder (!%p3319_p13), %s2828_s22, 0 }
  0x2c   : > { %205 = sbr.rel (%p3319_p13) target bundleno = 868 (0x364), region = 40 }
  0x33   : > { %2745 = dma.done.wait (%p3320_p1), [#allocation3], 15360   ;;  %p3321_p0 = pmov %p3320_p1 }
  0x34   : > { %p233_p5 = scmp.lt.s32.totalorder %s2828_s22, 1  ;;  %vm248_vm0 = vcmask 130048   ;;  %v246_v0 = vld [vmem:[%s3307_s1] sm:$0xff]  ;;  %v247_v1 = vld [vmem:[%s3307_s1 + $0x8] sm:$0xff]  ;;  %v2771_v11 = vmov 0.0|0.0   ;;  %vm2772_vm1 = vmmov 0  }
  0x35   : > { %2747 = vsyncadd (%p3321_p0), [#allocation3], 4294951936  ;;  %v2415_v3 = vpack.c.bf16 %v247_v1, %v246_v0  ;;  %2419 = vmatprep.subr.bf16.mxu1 %v2771_v11  ;;  %v2773_v12 = vmov 0.0   ;;  %v1094_v13 = vld [vmem:[#allocation2 + $0x148] sm:$0xff]  ;;  %v1096_v14 = vld [vmem:[#allocation2 + $0x158] sm:$0xff]  ;;  %vm395_vm2 = vcmask 523264  }
  0x36   : > { %s234_s6 = scalar_select %p233_p5, %s2828_s22, 1  ;;  %2364 = vmatprep.mubr.msk.f32.mxu1 %vm2772_vm1, %v2773_v12  ;;  %v1093_v15 = vld [vmem:[#allocation2 + $0x140] sm:$0xff]  ;;  %v2463_v16 = vpack.c.bf16 %v1096_v14, %v1094_v13  ;;  %v1095_v17 = vld [vmem:[#allocation2 + $0x150] sm:$0xff]  ;;  %v1098_v18 = vld [vmem:[#allocation2 + $0x168] sm:$0xff]  ;;  %vm623_vm3 = vcmask 1045504   ;;  %vm1103_vm4 = vcmask 1046528  }
  0x37   : > { %2416 = vmatprep.subr.bf16.mxu0 %v2415_v3  ;;  %v1100_v19 = vld [vmem:[#allocation2 + $0x178] sm:$0xff]  ;;  %v2465_v20 = vpack.c.bf16 %v1095_v17, %v1093_v15  ;;  %v1097_v22 = vld [vmem:[#allocation2 + $0x160] sm:$0xff]  ;;  %v1099_v23 = vld [vmem:[#allocation2 + $0x170] sm:$0xff]  ;;  %vm633_vm5 = vcmask 326656   ;;  %vm847_vm6 = vcmask 1043456   ;;  %vm1229_vm7 = vcmask 1044480  }
  0x38   : > { %s2295_s9 = sshll.u32 %s234_s6, 6  ;;  %2418 = vmatpush3.bf16.msra.mxu0 %v2415_v3  ;;  %v2467_v21 = vpack.c.bf16 %v1100_v19, %v1098_v18  ;;  %v2469_v24 = vpack.c.bf16 %v1099_v23, %v1097_v22  ;;  %v378_v37 = vld [vmem:[%s3308_s2] sm:$0xff]  ;;  %v379_v38 = vld [vmem:[%s3308_s2 + $0x8] sm:$0xff]  ;;  %v380_v39 = vld [vmem:[%s3308_s2 + $0x10] sm:$0xff]  ;;  %vm977_vm8 = vcmask 1041408   ;;  %vm1355_vm9 = vcmask 1042432  }
  0x39   : > { %s237_s11 = scalar_lea.vmem %s3306_s0, %s2295_s9  ;;  %2464 = vmatprep.subr.bf16.mxu0 %v2463_v16  ;;  %v381_v40 = vld [vmem:[%s3308_s2 + $0x18] sm:$0xff]  ;;  %v382_v41 = vld [vmem:[%s3308_s2 + $0x20] sm:$0xff]  ;;  %v383_v42 = vld [vmem:[%s3308_s2 + $0x28] sm:$0xff]  ;;  %vm1481_vm10 = vcmask 1040384   ;;  %s230_s23 = sand.u32 1, %s2758_s19  }
  0x3a   : > { %v238_v2 = vld [vmem:[%s237_s11] sm:$0xff]  ;;  %v239_v4 = vld [vmem:[%s237_s11 + $0x8] sm:$0xff]  ;;  %v240_v5 = vld [vmem:[%s237_s11 + $0x10] sm:$0xff]  ;;  %s2214_s25 = sshll.u32 %s230_s23, 6  ;;  %s2296_s9 = sshll.u32 %s2828_s22, 10 }
  0x3b   : > { %2336 = vmatprep.mubr.msk.f32.mxu0 %vm248_vm0, %v238_v2  ;;  %v241_v6 = vld [vmem:[%s237_s11 + $0x18] sm:$0xff]  ;;  %v242_v7 = vld [vmem:[%s237_s11 + $0x20] sm:$0xff]  ;;  %v243_v8 = vld [vmem:[%s237_s11 + $0x28] sm:$0xff]  ;;  %s3244_s26 = scalar_lea.vmem [#allocation5], %s2214_s25  ;;  %s3265_s22 = scalar_lea.sflag [#allocation4], %s230_s23 }
  0x3c   : > { %2337 = vmatmul.mubr.msk.f32.vlgmr.msra.gmra.mrb[0].mxu0 %vm248_vm0, %v239_v4  ;;  %v244_v9 = vld [vmem:[%s237_s11 + $0x30] sm:$0xff]  ;;  %v245_v10 = vld [vmem:[%s237_s11 + $0x38] sm:$0xff]  ;;  %v386_v45 = vld [vmem:[%s3308_s2 + $0x40] sm:$0xff]  ;;  %s2134_s6 = sshll.u32 %s3244_s26, 4  ;;  %s3259_s11 = scalar_lea.hbm %s3311_s5, %s2296_s9  ;;  %s3254_s6 = int_to_ptr.vmem [resolvable:$true] %s2134_s6 }
  0x3d   : > { %2339 = vmatprep.mubr.msk.f32.mxu0 %vm248_vm0, %v240_v5  ;;  %2466 = vmatpush1.bf16.msra.mxu0 %v2465_v20  ;;  %v384_v43 = vld [vmem:[%s3308_s2 + $0x30] sm:$0xff]  ;;  %v385_v44 = vld [vmem:[%s3308_s2 + $0x38] sm:$0xff]  ;;  %v387_v46 = vld [vmem:[%s3308_s2 + $0x48] sm:$0xff]  ;;  %s2700_s7 = scalar_lea.vmem %s3254_s6, 1024  ;;  %p3322_p9 = scmp.ne.s32.totalorder %s3315_s28, 0 }
  0x3e   : > { %2468 = vmatprep.subr.bf16.mxu0 %v2467_v21  ;;  %v388_v47 = vld [vmem:[%s3308_s2 + $0x50] sm:$0xff]  ;;  %v389_v48 = vld [vmem:[%s3308_s2 + $0x58] sm:$0xff]  ;;  %v390_v49 = vld [vmem:[%s3308_s2 + $0x60] sm:$0xff]  ;;  %p2701_p6 = scmp.ne.s32.totalorder %s3254_s6, %s2700_s7  ;;  %s2774_s12 = smov [#allocation5]  }
  0x3f   : > { %v391_v50 = vld [vmem:[%s3308_s2 + $0x68] sm:$0xff]  ;;  %v392_v51 = vld [vmem:[%s3308_s2 + $0x70] sm:$0xff]  ;;  %v393_v52 = vld [vmem:[%s3308_s2 + $0x78] sm:$0xff]  ;;  %s2704_s30 = sshll.u32 %s2774_s12, 4  ;;  %s2705_s30 = int_to_ptr.vmem [resolvable:$false] %s2704_s30 }
  0x40   : > { %2340 = vmatmul.mubr.msk.f32.gmra.mrb[2].mxu0 %vm248_vm0, %v241_v6  ;;  %v394_v53 = vld [vmem:[%s3308_s2 + $0x80] sm:$0xff]  ;;  %v1102_v54 = vld [vmem:[#allocation2 + $0x188] sm:$0xff]  ;;  %v609_v55 = vld [vmem:[#allocation2 + $0x58] sm:$0xff]  ;;  %p2702_p10 = pnand %p2701_p6, %p3322_p9  ;;  %s2706_s13 = scalar_lea.vmem %s2705_s30, 2048 }
  0x41   : > { %2342 = vmatprep.mubr.msk.f32.mxu0 %vm248_vm0, %v242_v7  ;;  %2470 = vmatpush1.bf16.msra.mxu0 %v2469_v24  ;;  %v611_v56 = vld [vmem:[#allocation2 + $0x68] sm:$0xff]  ;;  %v1101_v58 = vld [vmem:[#allocation2 + $0x180] sm:$0xff]  ;;  %v608_v59 = vld [vmem:[#allocation2 + $0x50] sm:$0xff]  ;;  %p2707_p2 = scmp.lt.s32.totalorder %s3254_s6, %s2705_s30  ;;  %p2708_p3 = scmp.lt.s32.totalorder %s2706_s13, %s2700_s7 }
  0x42   : > { %1129 = vmatprep.subr.mxu0 %v1102_v54  ;;  %v2431_v57 = vpack.c.bf16 %v611_v56, %v609_v55  ;;  %v610_v60 = vld [vmem:[#allocation2 + $0x60] sm:$0xff]  ;;  %v1220_v61 = vld [vmem:[#allocation2 + $0x198] sm:$0xff]  ;;  %v1222_v63 = vld [vmem:[#allocation2 + $0x1a8] sm:$0xff]  ;;  %p2703_p12 = pneg %p2702_p10 }
  0x43   : > { %v2433_v62 = vpack.c.bf16 %v610_v60, %v608_v59  ;;  %v2471_v0 = vpack.c.bf16 %v1222_v63, %v1220_v61  ;;  %v613_v1 = vld [vmem:[#allocation2 + $0x78] sm:$0xff]  ;;  %v615_v2 = vld [vmem:[#allocation2 + $0x88] sm:$0xff]  ;;  %v612_v4 = vld [vmem:[#allocation2 + $0x70] sm:$0xff]  ;;  %p2709_p4 = por %p2708_p3, %p2707_p2 }
  0x44   : > { %2343 = vmatmul.mubr.msk.f32.gmra.mrb[4].mxu0 %vm248_vm0, %v243_v8  ;;  %v2435_v3 = vpack.c.bf16 %v615_v2, %v613_v1  ;;  %v614_v5 = vld [vmem:[#allocation2 + $0x80] sm:$0xff]  ;;  %v617_v7 = vld [vmem:[#allocation2 + $0x98] sm:$0xff]  ;;  %v616_v8 = vld [vmem:[#allocation2 + $0x90] sm:$0xff] }
  0x45   : > { %2345 = vmatprep.mubr.msk.f32.mxu0 %vm248_vm0, %v244_v9  ;;  %1130 = vmatpush1.msra.mxu0 %v1101_v58  ;;  %v2437_v6 = vpack.c.bf16 %v614_v5, %v612_v4  ;;  %v598_v9 = vld [vmem:[#allocation2 + $0x8] sm:$0xff]  ;;  %v1219_v15 = vld [vmem:[#allocation2 + $0x190] sm:$0xff]  ;;  %v1221_v16 = vld [vmem:[#allocation2 + $0x1a0] sm:$0xff]  ;;  %p2710_p7 = pnand %p2709_p4, %p2703_p12 }
  0x46   : > { %2472 = vmatprep.subr.bf16.mxu0 %v2471_v0  ;;  %v1224_v17 = vld [vmem:[#allocation2 + $0x1b8] sm:$0xff]  ;;  %v1226_v18 = vld [vmem:[#allocation2 + $0x1c8] sm:$0xff]  ;;  %v2473_v20 = vpack.c.bf16 %v1221_v16, %v1219_v15  ;;  %v1347_v54 = vld [vmem:[#allocation2 + $0x1f0] sm:$0xff] }
  0x47   : > { %v1350_v56 = vld [vmem:[#allocation2 + $0x208] sm:$0xff]  ;;  %v599_v63 = vld [vmem:[#allocation2 + $0x10] sm:$0xff]  ;;  %v604_v15 = vld [vmem:[#allocation2 + $0x38] sm:$0xff] }
  0x48   : > { %2346 = vmatmul.mubr.msk.f32.gmra.mrb[6].mxu0 %vm248_vm0, %v245_v10  ;;  %v600_v10 = vld [vmem:[#allocation2 + $0x18] sm:$0xff] }
  0x49   : > { %1185 = vmatprep.mubr.f32.mxu0 %v2773_v12 }
 0x10f   : > { %v2338_v25 = vpop.f32.mrb[0].mxu0 }
 0x110   : > { %v339_v26 = vpop.f32.mrb[1].mxu0 }
 0x111   : > { %v2420_v27 = vpack.c.bf16 %v2338_v25, %v339_v26  ;;  %v2475_v26 = vpack.c.bf16 %v1226_v18, %v1224_v17  ;;  %v601_v17 = vld [vmem:[#allocation2 + $0x20] sm:$0xff]  ;;  %v603_v18 = vld [vmem:[#allocation2 + $0x30] sm:$0xff] }
 0x113   : > { %v2341_v28 = vpop.f32.mrb[2].mxu0  ;;  %2421 = vmatpush3.bf16.msra.mxu1 %v2420_v27  ;;  %v1223_v27 = vld [vmem:[#allocation2 + $0x1b0] sm:$0xff] }
 0x114   : > { %v349_v29 = vpop.f32.mrb[3].mxu0  ;;  %2422 = vmatprep.subr.bf16.mxu1 %v2771_v11 }
 0x115   : > { %v2423_v30 = vpack.c.bf16 %v2341_v28, %v349_v29  ;;  %v1225_v28 = vld [vmem:[#allocation2 + $0x1c0] sm:$0xff] }
 0x117   : > { %v2344_v31 = vpop.f32.mrb[4].mxu0  ;;  %2424 = vmatpush3.bf16.msra.mxu1 %v2423_v30 }
 0x118   : > { %v359_v32 = vpop.f32.mrb[5].mxu0  ;;  %2425 = vmatprep.subr.bf16.mxu1 %v2771_v11 }
 0x119   : > { %v2426_v33 = vpack.c.bf16 %v2344_v31, %v359_v32 }
 0x11b   : > { %v2347_v34 = vpop.f32.mrb[6].mxu0  ;;  %2427 = vmatpush3.bf16.msra.mxu1 %v2426_v33 }
 0x11c   : > { %v369_v35 = vpop.f32.mrb[7].mxu0  ;;  %2428 = vmatprep.subr.bf16.mxu1 %v2771_v11  ;;  %v2439_v11 = vpack.c.bf16 %v600_v10, %v598_v9 }
 0x11d   : > { %v2429_v36 = vpack.c.bf16 %v2347_v34, %v369_v35  ;;  %v2477_v35 = vpack.c.bf16 %v1225_v28, %v1223_v27  ;;  %v2445_v28 = vpack.c.bf16 %v603_v18, %v601_v17  ;;  %v1475_v18 = vld [vmem:[#allocation2 + $0x250] sm:$0xff] }
 0x11f   : > { %2430 = vmatpush3.bf16.msra.mxu1 %v2429_v36 }
 0x120   : > { %2432 = vmatprep.subr.bf16.mxu1 %v2431_v57  ;;  %v1352_v57 = vld [vmem:[#allocation2 + $0x218] sm:$0xff] }
 0x121   : > { %v2483_v5 = vpack.c.bf16 %v1352_v57, %v1350_v56 }
 0x122   : > { %2365 = vmatmul.mubr.msk.f32.vlgmr.msra.gmra.mrb[0].mxu1 %vm395_vm2, %v378_v37  ;;  %v1228_v37 = vld [vmem:[#allocation2 + $0x1d8] sm:$0xff] }
 0x123   : > { %2367 = vmatprep.mubr.msk.f32.mxu1 %vm2772_vm1, %v2773_v12  ;;  %2434 = vmatpush1.bf16.msra.mxu1 %v2433_v62  ;;  %v597_v62 = vld [vmem:[#allocation2] sm:$0xff] }
 0x124   : > { %2436 = vmatprep.subr.bf16.mxu1 %v2435_v3 }
 0x126   : > { %2368 = vmatmul.mubr.msk.f32.gmra.mrb[2].mxu1 %vm395_vm2, %v379_v38  ;;  %v1346_v38 = vld [vmem:[#allocation2 + $0x1e8] sm:$0xff] }
 0x127   : > { %2370 = vmatprep.mubr.msk.f32.mxu1 %vm2772_vm1, %v2773_v12  ;;  %2438 = vmatpush1.bf16.msra.mxu1 %v2437_v6  ;;  %v1349_v6 = vld [vmem:[#allocation2 + $0x200] sm:$0xff] }
 0x128   : > { %650 = vmatprep.subr.mxu1 %v617_v7  ;;  %v1351_v7 = vld [vmem:[#allocation2 + $0x210] sm:$0xff] }
 0x12a   : > { %2371 = vmatmul.mubr.msk.f32.gmra.mrb[4].mxu1 %vm395_vm2, %v380_v39  ;;  %v1348_v39 = vld [vmem:[#allocation2 + $0x1f8] sm:$0xff] }
 0x12b   : > { %2373 = vmatprep.mubr.msk.f32.mxu1 %vm2772_vm1, %v2773_v12  ;;  %651 = vmatpush1.msra.mxu1 %v616_v8 }
 0x12c   : > { %2440 = vmatprep.subr.bf16.mxu1 %v2439_v11  ;;  %v2441_v11 = vpack.c.bf16 %v599_v63, %v597_v62  ;;  %v1476_v62 = vld [vmem:[#allocation2 + $0x258] sm:$0xff]  ;;  %v1478_v63 = vld [vmem:[#allocation2 + $0x268] sm:$0xff] }
 0x12d   : > { %v2491_v17 = vpack.c.bf16 %v1478_v63, %v1476_v62 }
 0x12e   : > { %2374 = vmatmul.mubr.msk.f32.gmra.mrb[6].mxu1 %vm395_vm2, %v381_v40 }
 0x12f   : > { %2376 = vmatprep.mubr.msk.f32.mxu1 %vm2772_vm1, %v2773_v12 }
 0x132   : > { %2377 = vmatmul.mubr.msk.f32.gmra.mrb[8].mxu1 %vm395_vm2, %v382_v41 }
 0x133   : > { %2379 = vmatprep.mubr.msk.f32.mxu1 %vm2772_vm1, %v2773_v12 }
 0x136   : > { %2380 = vmatmul.mubr.msk.f32.gmra.mrb[10].mxu1 %vm395_vm2, %v383_v42 }
 0x137   : > { %2382 = vmatprep.mubr.msk.f32.mxu1 %vm2772_vm1, %v2773_v12 }
 0x13a   : > { %2383 = vmatmul.mubr.msk.f32.gmra.mrb[12].mxu1 %vm395_vm2, %v384_v43 }
 0x13b   : > { %2385 = vmatprep.mubr.msk.f32.mxu1 %vm2772_vm1, %v2773_v12 }
 0x13e   : > { %2386 = vmatmul.mubr.msk.f32.gmra.mrb[14].mxu1 %vm395_vm2, %v385_v44 }
 0x13f   : > { %2388 = vmatprep.mubr.msk.f32.mxu1 %vm2772_vm1, %v2773_v12 }
 0x142   : > { %2389 = vmatmul.mubr.msk.f32.gmra.mrb[16].mxu1 %vm395_vm2, %v386_v45  ;;  %v1227_v45 = vld [vmem:[#allocation2 + $0x1d0] sm:$0xff] }
 0x143   : > { %2391 = vmatprep.mubr.msk.f32.mxu1 %vm2772_vm1, %v2773_v12 }
 0x146   : > { %2392 = vmatmul.mubr.msk.f32.gmra.mrb[18].mxu1 %vm395_vm2, %v387_v46  ;;  %v2479_v46 = vpack.c.bf16 %v1348_v39, %v1346_v38 }
 0x147   : > { %2394 = vmatprep.mubr.msk.f32.mxu1 %vm2772_vm1, %v2773_v12 }
 0x14a   : > { %2395 = vmatmul.mubr.msk.f32.gmra.mrb[20].mxu1 %vm395_vm2, %v388_v47 }
 0x14b   : > { %2397 = vmatprep.mubr.msk.f32.mxu1 %vm2772_vm1, %v2773_v12 }
 0x14e   : > { %2398 = vmatmul.mubr.msk.f32.gmra.mrb[22].mxu1 %vm395_vm2, %v389_v48 }
 0x14f   : > { %2400 = vmatprep.mubr.msk.f32.mxu1 %vm2772_vm1, %v2773_v12 }
 0x152   : > { %2401 = vmatmul.mubr.msk.f32.gmra.mrb[24].mxu1 %vm395_vm2, %v390_v49 }
 0x153   : > { %2403 = vmatprep.mubr.msk.f32.mxu1 %vm2772_vm1, %v2773_v12 }
 0x156   : > { %2404 = vmatmul.mubr.msk.f32.gmra.mrb[26].mxu1 %vm395_vm2, %v391_v50 }
 0x157   : > { %2406 = vmatprep.mubr.msk.f32.mxu1 %vm2772_vm1, %v2773_v12 }
 0x15a   : > { %2407 = vmatmul.mubr.msk.f32.gmra.mrb[28].mxu1 %vm395_vm2, %v392_v51 }
 0x15b   : > { %2409 = vmatprep.mubr.msk.f32.mxu1 %vm2772_vm1, %v2773_v12 }
 0x15e   : > { %2410 = vmatmul.mubr.msk.f32.gmra.mrb[30].mxu1 %vm395_vm2, %v393_v52 }
 0x15f   : > { %2412 = vmatprep.mubr.msk.f32.mxu1 %vm2772_vm1, %v2773_v12 }
 0x162   : > { %2413 = vmatmul.mubr.msk.f32.gmra.mrb[32].mxu1 %vm395_vm2, %v394_v53  ;;  %v1345_v53 = vld [vmem:[#allocation2 + $0x1e0] sm:$0xff] }
 0x163   : > { %706 = vmatprep.mubr.f32.mxu1 %v2773_v12  ;;  %v2481_v61 = vpack.c.bf16 %v1347_v54, %v1345_v53 }
 0x1f5   : > { %v3013_v13 = vpop.f32.mrb[0].mxu1 }
 0x1f6   : > { %v2366_v14 = vpop.f32.mrb[1].mxu1  ;;  %v1104_v21 = vrot.slane %v3013_v13, 1  ;;  %v1607_v22 = vrot.slane %v3013_v13, 2 }
 0x1f7   : > { %v602_v14 = vld [vmem:[#allocation2 + $0x28] sm:$0xff] }
 0x1f9   : > { %v3015_v19 = vpop.f32.mrb[2].mxu1 }
 0x1fa   : > { %v1105_v23 = vrot.slane %v3015_v19, 1  ;;  %v1608_v24 = vrot.slane %v3015_v19, 2  ;;  %v2369_v25 = vpop.f32.mrb[3].mxu1 }
 0x1fb   : > { %v2443_v25 = vpack.c.bf16 %v604_v15, %v602_v14  ;;  %v840_v15 = vld [vmem:[#allocation2 + $0xd8] sm:$0xff] }
 0x1fc   : > { %v1106_v29 = vsel %vm1103_vm4, %v1104_v21, %v1105_v23  ;;  %v3023_v30 = vsel %vm623_vm3, %v1607_v22, %v1608_v24 }
 0x1fd   : > { %v3025_v31 = vpop.f32.mrb[4].mxu1  ;;  %2258 = vmatmul.mubr.msk.f32.vlgmr.msra.gmra.mrb[8].mxu0 %vm633_vm5, %v1106_v29  ;;  %v1472_v29 = vld [vmem:[#allocation2 + $0x238] sm:$0xff] }
 0x1fe   : > { %v1107_v32 = vrot.slane %v3025_v31, 1  ;;  %v1610_v33 = vrot.slane %v3025_v31, 2  ;;  %2474 = vmatpush1.bf16.msra.mxu0 %v2473_v20  ;;  %v2372_v34 = vpop.f32.mrb[5].mxu1  ;;  %1191 = vmatprep.mubr.f32.mxu0 %v2773_v12 }
 0x1ff   : > { %2476 = vmatprep.subr.bf16.mxu0 %v2475_v26 }
 0x200   : > { %v1108_v36 = vsel %vm1103_vm4, %v1105_v23, %v1107_v32  ;;  %v3033_v40 = vsel %vm623_vm3, %v1608_v24, %v1610_v33  ;;  %v2485_v24 = vpack.c.bf16 %v1351_v7, %v1349_v6  ;;  %v838_v6 = vld [vmem:[#allocation2 + $0xc8] sm:$0xff] }
 0x201   : > { %v3035_v41 = vpop.f32.mrb[6].mxu1  ;;  %2259 = vmatmul.mubr.msk.f32.gmra.mrb[10].mxu0 %vm633_vm5, %v1108_v36 }
 0x202   : > { %v1109_v42 = vrot.slane %v3035_v41, 1  ;;  %v1612_v43 = vrot.slane %v3035_v41, 2  ;;  %v2375_v44 = vpop.f32.mrb[7].mxu1  ;;  %2478 = vmatpush1.bf16.msra.mxu0 %v2477_v35  ;;  %1197 = vmatprep.mubr.f32.mxu0 %v2773_v12  ;;  %v1354_v35 = vld [vmem:[#allocation2 + $0x228] sm:$0xff] }
 0x203   : > { %1255 = vmatprep.subr.mxu0 %v1228_v37 }
 0x204   : > { %v1110_v47 = vsel %vm1103_vm4, %v1107_v32, %v1109_v42  ;;  %v3043_v48 = vsel %vm623_vm3, %v1610_v33, %v1612_v43  ;;  %v1474_v32 = vld [vmem:[#allocation2 + $0x248] sm:$0xff] }
 0x205   : > { %v533_v49 = vpop.f32.mrb[8].mxu1  ;;  %2260 = vmatmul.mubr.msk.f32.gmra.mrb[12].mxu0 %vm633_vm5, %v1110_v47  ;;  %v2487_v44 = vpack.c.bf16 %v1474_v32, %v1472_v29  ;;  %v1353_v47 = vld [vmem:[#allocation2 + $0x220] sm:$0xff] }
 0x206   : > { %v624_v50 = vrot.slane %v533_v49, 2  ;;  %v1111_v51 = vrot.slane %v533_v49, 1  ;;  %v2378_v52 = vpop.f32.mrb[9].mxu1  ;;  %1203 = vmatprep.mubr.f32.mxu0 %v2773_v12  ;;  %1256 = vmatpush1.msra.mxu0 %v1227_v45  ;;  %v1230_v59 = vrot.slane %v533_v49, 3  ;;  %v1731_v0 = vrot.slane %v533_v49, 4  ;;  %v606_v49 = vld [vmem:[#allocation2 + $0x48] sm:$0xff] }
 0x207   : > { %2480 = vmatprep.subr.bf16.mxu0 %v2479_v46  ;;  %v605_v52 = vld [vmem:[#allocation2 + $0x40] sm:$0xff] }
 0x208   : > { %v1112_v55 = vsel %vm1103_vm4, %v1109_v42, %v1111_v51  ;;  %v3049_v58 = vsel %vm623_vm3, %v1612_v43, %v624_v50  ;;  %v834_v42 = vld [vmem:[#allocation2 + $0xa8] sm:$0xff]  ;;  %v836_v43 = vld [vmem:[#allocation2 + $0xb8] sm:$0xff] }
 0x209   : > { %v538_v60 = vpop.f32.mrb[10].mxu1  ;;  %2261 = vmatmul.mubr.msk.f32.gmra.mrb[14].mxu0 %vm633_vm5, %v1112_v55  ;;  %v2447_v53 = vpack.c.bf16 %v836_v43, %v834_v42 }
 0x20a   : > { %v625_v1 = vrot.slane %v538_v60, 2  ;;  %v1231_v2 = vrot.slane %v538_v60, 3  ;;  %v1732_v3 = vrot.slane %v538_v60, 4  ;;  %v2381_v4 = vpop.f32.mrb[11].mxu1  ;;  %1311 = vmatprep.mubr.f32.mxu0 %v2773_v12 }
 0x20b   : > { %v833_v4 = vld [vmem:[#allocation2 + $0xa0] sm:$0xff] }
 0x20c   : > { %v626_v8 = vsel %vm623_vm3, %v624_v50, %v625_v1  ;;  %v1232_v9 = vsel %vm1229_vm7, %v1230_v59, %v1231_v2  ;;  %v3056_v10 = vsel %vm847_vm6, %v1731_v0, %v1732_v3  ;;  %v1471_v59 = vld [vmem:[#allocation2 + $0x230] sm:$0xff] }
 0x20d   : > { %v543_v16 = vpop.f32.mrb[12].mxu1  ;;  %2242 = vmatmul.mubr.msk.f32.vlgmr.msra.gmra.mrb[34].mxu1 %vm633_vm5, %v626_v8  ;;  %2262 = vmatmul.mubr.msk.f32.vlgmr.msra.gmra.mrb[8].mxu0 %vm633_vm5, %v1232_v9 }
 0x20e   : > { %v627_v20 = vrot.slane %v543_v16, 2  ;;  %v1233_v21 = vrot.slane %v543_v16, 3  ;;  %v1734_v22 = vrot.slane %v543_v16, 4  ;;  %2482 = vmatpush1.bf16.msra.mxu0 %v2481_v61  ;;  %v2384_v23 = vpop.f32.mrb[13].mxu1  ;;  %712 = vmatprep.mubr.f32.mxu1 %v2773_v12  ;;  %v1473_v61 = vld [vmem:[#allocation2 + $0x240] sm:$0xff] }
 0x20f   : > { %1317 = vmatprep.mubr.f32.mxu0 %v2773_v12  ;;  %2484 = vmatprep.subr.bf16.mxu0 %v2483_v5  ;;  %v835_v5 = vld [vmem:[#allocation2 + $0xb0] sm:$0xff]  ;;  %v2489_v16 = vpack.c.bf16 %v1473_v61, %v1471_v59  ;;  %v1477_v23 = vld [vmem:[#allocation2 + $0x260] sm:$0xff] }
 0x210   : > { %v628_v26 = vsel %vm623_vm3, %v625_v1, %v627_v20  ;;  %v1234_v27 = vsel %vm1229_vm7, %v1231_v2, %v1233_v21  ;;  %2442 = vmatpush1.bf16.msra.mxu1 %v2441_v11  ;;  %v3065_v33 = vsel %vm847_vm6, %v1732_v3, %v1734_v22  ;;  %v841_v61 = vld [vmem:[#allocation2 + $0xe0] sm:$0xff] }
 0x211   : > { %v548_v34 = vpop.f32.mrb[14].mxu1  ;;  %2243 = vmatmul.mubr.msk.f32.gmra.mrb[36].mxu1 %vm633_vm5, %v628_v26  ;;  %2263 = vmatmul.mubr.msk.f32.gmra.mrb[10].mxu0 %vm633_vm5, %v1234_v27  ;;  %v839_v26 = vld [vmem:[#allocation2 + $0xd0] sm:$0xff] }
 0x212   : > { %v629_v36 = vrot.slane %v548_v34, 2  ;;  %v1235_v37 = vrot.slane %v548_v34, 3  ;;  %v1736_v38 = vrot.slane %v548_v34, 4  ;;  %v2387_v39 = vpop.f32.mrb[15].mxu1  ;;  %2486 = vmatpush1.bf16.msra.mxu0 %v2485_v24  ;;  %718 = vmatprep.mubr.f32.mxu1 %v2773_v12  ;;  %v2449_v24 = vpack.c.bf16 %v835_v5, %v833_v4  ;;  %v1597_v5 = vld [vmem:[#allocation2 + $0x280] sm:$0xff] }
 0x213   : > { %1323 = vmatprep.mubr.f32.mxu0 %v2773_v12  ;;  %2444 = vmatprep.subr.bf16.mxu1 %v2443_v25  ;;  %v837_v25 = vld [vmem:[#allocation2 + $0xc0] sm:$0xff]  ;;  %v1598_v39 = vld [vmem:[#allocation2 + $0x288] sm:$0xff] }
 0x214   : > { %v630_v45 = vsel %vm623_vm3, %v627_v20, %v629_v36  ;;  %v1236_v46 = vsel %vm1229_vm7, %v1233_v21, %v1235_v37  ;;  %1381 = vmatprep.subr.mxu0 %v1354_v35  ;;  %2446 = vmatpush1.bf16.msra.mxu1 %v2445_v28  ;;  %v3074_v50 = vsel %vm847_vm6, %v1734_v22, %v1736_v38 }
 0x215   : > { %v553_v51 = vpop.f32.mrb[16].mxu1  ;;  %2244 = vmatmul.mubr.msk.f32.gmra.mrb[38].mxu1 %vm633_vm5, %v630_v45  ;;  %2264 = vmatmul.mubr.msk.f32.gmra.mrb[12].mxu0 %vm633_vm5, %v1236_v46  ;;  %v2451_v28 = vpack.c.bf16 %v840_v15, %v838_v6  ;;  %v1480_v45 = vld [vmem:[#allocation2 + $0x278] sm:$0xff]  ;;  %v842_v46 = vld [vmem:[#allocation2 + $0xe8] sm:$0xff]  ;;  %v965_v15 = vld [vmem:[#allocation2 + $0x100] sm:$0xff] }
 0x216   : > { %v848_v54 = vrot.slane %v553_v51, 4  ;;  %v2390_v55 = vpop.f32.mrb[17].mxu1  ;;  %724 = vmatprep.mubr.f32.mxu1 %v2773_v12  ;;  %1329 = vmatprep.mubr.f32.mxu0 %v2773_v12  ;;  %v631_v56 = vrot.slane %v553_v51, 2  ;;  %v1237_v57 = vrot.slane %v553_v51, 3  ;;  %v1356_v1 = vrot.slane %v553_v51, 5  ;;  %v1602_v6 = vld [vmem:[#allocation2 + $0x2a8] sm:$0xff] }
 0x217   : > { %1382 = vmatpush1.msra.mxu0 %v1353_v47  ;;  %751 = vmatprep.subr.mxu1 %v606_v49  ;;  %v1855_v7 = vrot.slane %v553_v51, 6 }
 0x218   : > { %v632_v60 = vsel %vm623_vm3, %v629_v36, %v631_v56  ;;  %752 = vmatpush1.msra.mxu1 %v605_v52  ;;  %2488 = vmatprep.subr.bf16.mxu0 %v2487_v44  ;;  %v3082_v0 = vsel %vm847_vm6, %v1736_v38, %v848_v54  ;;  %v1238_v3 = vsel %vm1229_vm7, %v1235_v37, %v1237_v57 }
 0x219   : > { %v558_v2 = vpop.f32.mrb[18].mxu1  ;;  %2245 = vmatmul.mubr.msk.f32.gmra.mrb[40].mxu1 %vm633_vm5, %v632_v60  ;;  %2448 = vmatprep.subr.bf16.mxu1 %v2447_v53  ;;  %v2493_v36 = vpack.c.bf16 %v1477_v23, %v1475_v18  ;;  %v2453_v37 = vpack.c.bf16 %v839_v26, %v837_v25  ;;  %v964_v53 = vld [vmem:[#allocation2 + $0xf8] sm:$0xff] }
 0x21a   : > { %v849_v8 = vrot.slane %v558_v2, 4  ;;  %v1357_v9 = vrot.slane %v558_v2, 5  ;;  %v1856_v11 = vrot.slane %v558_v2, 6  ;;  %2265 = vmatmul.mubr.msk.f32.gmra.mrb[14].mxu0 %vm633_vm5, %v1238_v3  ;;  %v2393_v14 = vpop.f32.mrb[19].mxu1  ;;  %807 = vmatprep.mubr.f32.mxu1 %v2773_v12  ;;  %v968_v23 = vld [vmem:[#allocation2 + $0x118] sm:$0xff] }
 0x21b   : > { %1437 = vmatprep.mubr.f32.mxu0 %v2773_v12  ;;  %v963_v14 = vld [vmem:[#allocation2 + $0xf0] sm:$0xff] }
 0x21c   : > { %v3090_v20 = vsel %vm847_vm6, %v848_v54, %v849_v8  ;;  %v1358_v21 = vsel %vm1355_vm9, %v1356_v1, %v1357_v9  ;;  %v3094_v22 = vsel %vm977_vm8, %v1855_v7, %v1856_v11  ;;  %v966_v54 = vld [vmem:[#allocation2 + $0x108] sm:$0xff] }
 0x21d   : > { %v563_v27 = vpop.f32.mrb[20].mxu1  ;;  %2246 = vmatmul.mubr.msk.f32.vlgmr.msra.gmra.mrb[34].mxu1 %vm633_vm5, %v3013_v13  ;;  %v1600_v13 = vld [vmem:[#allocation2 + $0x298] sm:$0xff]  ;;  %v2455_v62 = vpack.c.bf16 %v966_v54, %v964_v53 }
 0x21e   : > { %v851_v29 = vrot.slane %v563_v27, 4  ;;  %v1359_v32 = vrot.slane %v563_v27, 5  ;;  %v1858_v34 = vrot.slane %v563_v27, 6  ;;  %2266 = vmatmul.mubr.msk.f32.vlgmr.msra.gmra.mrb[8].mxu0 %vm633_vm5, %v1358_v21  ;;  %v2396_v35 = vpop.f32.mrb[21].mxu1  ;;  %813 = vmatprep.mubr.f32.mxu1 %v2773_v12  ;;  %v2495_v55 = vpack.c.bf16 %v1600_v13, %v1598_v39 }
 0x21f   : > { %2490 = vmatpush1.bf16.msra.mxu0 %v2489_v16  ;;  %1443 = vmatprep.mubr.f32.mxu0 %v2773_v12 }
 0x220   : > { %v1360_v38 = vsel %vm1355_vm9, %v1357_v9, %v1359_v32  ;;  %2492 = vmatprep.subr.bf16.mxu0 %v2491_v17  ;;  %2450 = vmatpush1.bf16.msra.mxu1 %v2449_v24  ;;  %v3103_v42 = vsel %vm847_vm6, %v849_v8, %v851_v29  ;;  %v3106_v43 = vsel %vm977_vm8, %v1856_v11, %v1858_v34  ;;  %v1604_v11 = vld [vmem:[#allocation2 + $0x2b8] sm:$0xff]  ;;  %v970_v24 = vld [vmem:[#allocation2 + $0x128] sm:$0xff] }
 0x221   : > { %v568_v44 = vpop.f32.mrb[22].mxu1  ;;  %2247 = vmatmul.mubr.msk.f32.gmra.mrb[36].mxu1 %vm633_vm5, %v3015_v19  ;;  %2452 = vmatprep.subr.bf16.mxu1 %v2451_v28  ;;  %v1479_v19 = vld [vmem:[#allocation2 + $0x270] sm:$0xff]  ;;  %v2499_v27 = vpack.c.bf16 %v1604_v11, %v1602_v6  ;;  %v1601_v28 = vld [vmem:[#allocation2 + $0x2a0] sm:$0xff]  ;;  %v2459_v35 = vpack.c.bf16 %v970_v24, %v968_v23  ;;  %v1726_v6 = vld [vmem:[#allocation2 + $0x2f8] sm:$0xff] }
 0x222   : > { %v853_v47 = vrot.slane %v568_v44, 4  ;;  %v1361_v49 = vrot.slane %v568_v44, 5  ;;  %v1860_v51 = vrot.slane %v568_v44, 6  ;;  %2267 = vmatmul.mubr.msk.f32.gmra.mrb[10].mxu0 %vm633_vm5, %v1360_v38  ;;  %v2399_v52 = vpop.f32.mrb[23].mxu1  ;;  %819 = vmatprep.mubr.f32.mxu1 %v2773_v12  ;;  %v1728_v11 = vld [vmem:[#allocation2 + $0x308] sm:$0xff]  ;;  %v1848_v23 = vld [vmem:[#allocation2 + $0x338] sm:$0xff] }
 0x223   : > { %2494 = vmatpush1.bf16.msra.mxu0 %v2493_v36  ;;  %1449 = vmatprep.mubr.f32.mxu0 %v2773_v12  ;;  %v967_v36 = vld [vmem:[#allocation2 + $0x110] sm:$0xff]  ;;  %v1724_v52 = vld [vmem:[#allocation2 + $0x2e8] sm:$0xff] }
 0x224   : > { %v1362_v56 = vsel %vm1355_vm9, %v1359_v32, %v1361_v49  ;;  %1507 = vmatprep.subr.mxu0 %v1480_v45  ;;  %2454 = vmatpush1.bf16.msra.mxu1 %v2453_v37  ;;  %v3115_v57 = vsel %vm847_vm6, %v851_v29, %v853_v47  ;;  %v3118_v59 = vsel %vm977_vm8, %v1858_v34, %v1860_v51  ;;  %v1603_v29 = vld [vmem:[#allocation2 + $0x2b0] sm:$0xff]  ;;  %v969_v37 = vld [vmem:[#allocation2 + $0x120] sm:$0xff] }
 0x225   : > { %v573_v60 = vpop.f32.mrb[24].mxu1  ;;  %2248 = vmatmul.mubr.msk.f32.gmra.mrb[38].mxu1 %vm633_vm5, %v3025_v31  ;;  %873 = vmatprep.subr.mxu1 %v842_v46  ;;  %v1599_v31 = vld [vmem:[#allocation2 + $0x290] sm:$0xff]  ;;  %v2457_v32 = vpack.c.bf16 %v965_v15, %v963_v14  ;;  %v2501_v44 = vpack.c.bf16 %v1603_v29, %v1601_v28  ;;  %v2507_v15 = vpack.c.bf16 %v1728_v11, %v1726_v6 }
 0x226   : > { %v855_v63 = vrot.slane %v573_v60, 4  ;;  %v978_v1 = vrot.slane %v573_v60, 6  ;;  %v1363_v2 = vrot.slane %v573_v60, 5  ;;  %2268 = vmatmul.mubr.msk.f32.gmra.mrb[12].mxu0 %vm633_vm5, %v1362_v56  ;;  %v2402_v3 = vpop.f32.mrb[25].mxu1  ;;  %825 = vmatprep.mubr.f32.mxu1 %v2773_v12  ;;  %v1482_v16 = vrot.slane %v573_v60, 7  ;;  %v972_v56 = vld [vmem:[#allocation2 + $0x138] sm:$0xff] }
 0x227   : > { %1455 = vmatprep.mubr.f32.mxu0 %v2773_v12  ;;  %1508 = vmatpush1.msra.mxu0 %v1479_v19  ;;  %v2497_v25 = vpack.c.bf16 %v1599_v31, %v1597_v5  ;;  %v1721_v5 = vld [vmem:[#allocation2 + $0x2d0] sm:$0xff] }
 0x228   : > { %v1364_v4 = vsel %vm1355_vm9, %v1361_v49, %v1363_v2  ;;  %874 = vmatpush1.msra.mxu1 %v841_v61  ;;  %2496 = vmatprep.subr.bf16.mxu0 %v2495_v55  ;;  %v3127_v7 = vsel %vm847_vm6, %v853_v47, %v855_v63  ;;  %v3130_v8 = vsel %vm977_vm8, %v1860_v51, %v978_v1  ;;  %v1606_v49 = vld [vmem:[#allocation2 + $0x2c8] sm:$0xff]  ;;  %v1722_v51 = vld [vmem:[#allocation2 + $0x2d8] sm:$0xff]  ;;  %v971_v63 = vld [vmem:[#allocation2 + $0x130] sm:$0xff] }
 0x229   : > { %v3132_v9 = vpop.f32.mrb[26].mxu1  ;;  %2249 = vmatmul.mubr.msk.f32.gmra.mrb[40].mxu1 %vm633_vm5, %v3035_v41  ;;  %2456 = vmatprep.subr.bf16.mxu1 %v2455_v62  ;;  %v2503_v60 = vpack.c.bf16 %v1724_v52, %v1722_v51  ;;  %v1851_v29 = vld [vmem:[#allocation2 + $0x350] sm:$0xff] }
 0x22a   : > { %v979_v17 = vrot.slane %v3132_v9, 6  ;;  %v1483_v18 = vrot.slane %v3132_v9, 7  ;;  %2269 = vmatmul.mubr.msk.f32.gmra.mrb[14].mxu0 %vm633_vm5, %v1364_v4  ;;  %v2405_v21 = vpop.f32.mrb[27].mxu1  ;;  %929 = vmatprep.mubr.f32.mxu1 %v2773_v12 }
 0x22b   : > { %1563 = vmatprep.mubr.f32.mxu0 %v2773_v12  ;;  %v1846_v21 = vld [vmem:[#allocation2 + $0x328] sm:$0xff] }
 0x22c   : > { %v3142_v41 = vsel %vm977_vm8, %v978_v1, %v979_v17  ;;  %v1484_v26 = vsel %vm1481_vm10, %v1482_v16, %v1483_v18  ;;  %v1725_v16 = vld [vmem:[#allocation2 + $0x2f0] sm:$0xff]  ;;  %v2511_v24 = vpack.c.bf16 %v1848_v23, %v1846_v21 }
 0x22d   : > { %v3145_v34 = vpop.f32.mrb[28].mxu1  ;;  %2250 = vmatmul.mubr.msk.f32.vlgmr.msra.gmra.mrb[34].mxu1 %vm633_vm5, %v3090_v20  ;;  %v2461_v20 = vpack.c.bf16 %v969_v37, %v967_v36  ;;  %v1970_v36 = vld [vmem:[#allocation2 + $0x378] sm:$0xff]  ;;  %v1972_v37 = vld [vmem:[#allocation2 + $0x388] sm:$0xff] }
 0x22e   : > { %v981_v38 = vrot.slane %v3145_v34, 6  ;;  %v1485_v39 = vrot.slane %v3145_v34, 7  ;;  %2270 = vmatmul.mubr.msk.f32.vlgmr.msra.gmra.mrb[8].mxu0 %vm633_vm5, %v1484_v26  ;;  %v2408_v13 = vpop.f32.mrb[29].mxu1  ;;  %935 = vmatprep.mubr.f32.mxu1 %v2773_v12  ;;  %v1852_v26 = vld [vmem:[#allocation2 + $0x358] sm:$0xff] }
 0x22f   : > { %2498 = vmatpush1.bf16.msra.mxu0 %v2497_v25  ;;  %1569 = vmatprep.mubr.f32.mxu0 %v2773_v12  ;;  %v1847_v25 = vld [vmem:[#allocation2 + $0x330] sm:$0xff]  ;;  %v1974_v13 = vld [vmem:[#allocation2 + $0x398] sm:$0xff] }
 0x230   : > { %v1486_v45 = vsel %vm1481_vm10, %v1483_v18, %v1485_v39  ;;  %2500 = vmatprep.subr.bf16.mxu0 %v2499_v27  ;;  %2458 = vmatpush1.bf16.msra.mxu1 %v2457_v32  ;;  %v982_v46 = vsel %vm977_vm8, %v979_v17, %v981_v38  ;;  %v1727_v17 = vld [vmem:[#allocation2 + $0x300] sm:$0xff]  ;;  %v1730_v18 = vld [vmem:[#allocation2 + $0x318] sm:$0xff] }
 0x231   : > { %v3156_v47 = vpop.f32.mrb[30].mxu1  ;;  %2251 = vmatmul.mubr.msk.f32.gmra.mrb[36].mxu1 %vm633_vm5, %v3103_v42  ;;  %2460 = vmatprep.subr.bf16.mxu1 %v2459_v35  ;;  %v1605_v42 = vld [vmem:[#allocation2 + $0x2c0] sm:$0xff]  ;;  %v1854_v35 = vld [vmem:[#allocation2 + $0x368] sm:$0xff] }
 0x232   : > { %v983_v53 = vrot.slane %v3156_v47, 6  ;;  %v1487_v54 = vrot.slane %v3156_v47, 7  ;;  %2271 = vmatmul.mubr.msk.f32.gmra.mrb[10].mxu0 %vm633_vm5, %v1486_v45  ;;  %v2411_v55 = vpop.f32.mrb[31].mxu1  ;;  %941 = vmatprep.mubr.f32.mxu1 %v2773_v12 }
 0x233   : > { %2502 = vmatpush1.bf16.msra.mxu0 %v2501_v44  ;;  %1575 = vmatprep.mubr.f32.mxu0 %v2773_v12  ;;  %v1976_v44 = vld [vmem:[#allocation2 + $0x3a8] sm:$0xff] }
 0x234   : > { %v1488_v19 = vsel %vm1481_vm10, %v1485_v39, %v1487_v54  ;;  %1631 = vmatprep.subr.mxu0 %v1606_v49  ;;  %2462 = vmatpush1.bf16.msra.mxu1 %v2461_v20  ;;  %v984_v61 = vsel %vm977_vm8, %v981_v38, %v983_v53  ;;  %v2519_v38 = vpack.c.bf16 %v1972_v37, %v1970_v36  ;;  %v1971_v39 = vld [vmem:[#allocation2 + $0x380] sm:$0xff]  ;;  %v1973_v20 = vld [vmem:[#allocation2 + $0x390] sm:$0xff]  ;;  %v1978_v49 = vld [vmem:[#allocation2 + $0x3b8] sm:$0xff] }
 0x235   : > { %v3167_v62 = vpop.f32.mrb[32].mxu1  ;;  %2252 = vmatmul.mubr.msk.f32.gmra.mrb[38].mxu1 %vm633_vm5, %v3115_v57  ;;  %1003 = vmatprep.subr.mxu1 %v972_v56  ;;  %v1723_v57 = vld [vmem:[#allocation2 + $0x2e0] sm:$0xff]  ;;  %v2523_v45 = vpack.c.bf16 %v1976_v44, %v1974_v13 }
 0x236   : > { %v985_v1 = vrot.slane %v3167_v62, 6  ;;  %v1489_v2 = vrot.slane %v3167_v62, 7  ;;  %2272 = vmatmul.mubr.msk.f32.gmra.mrb[12].mxu0 %vm633_vm5, %v1488_v19  ;;  %v2414_v3 = vpop.f32.mrb[33].mxu1  ;;  %947 = vmatprep.mubr.f32.mxu1 %v2773_v12  ;;  %v2505_v14 = vpack.c.bf16 %v1723_v57, %v1721_v5 }
 0x237   : > { %1581 = vmatprep.mubr.f32.mxu0 %v2773_v12  ;;  %1632 = vmatpush1.msra.mxu0 %v1605_v42 }
 0x238   : > { %v1490_v4 = vsel %vm1481_vm10, %v1487_v54, %v1489_v2  ;;  %1004 = vmatpush1.msra.mxu1 %v971_v63  ;;  %2504 = vmatprep.subr.bf16.mxu0 %v2503_v60  ;;  %v986_v31 = vsel %vm977_vm8, %v983_v53, %v985_v1  ;;  %v2086_v53 = vlaneseq }
 0x239   : > { %2253 = vmatmul.mubr.msk.f32.gmra.mrb[40].mxu1 %vm633_vm5, %v3127_v7  ;;  %v2509_v7 = vpack.c.bf16 %v1727_v17, %v1725_v16 }
 0x23a   : > { %2273 = vmatmul.mubr.msk.f32.gmra.mrb[14].mxu0 %vm633_vm5, %v1490_v4  ;;  %1059 = vmatprep.mubr.f32.mxu1 %v2773_v12  ;;  %v2087_v54 = vshrl.u32 %v2086_v53, 7 }
 0x23b   : > { %1687 = vmatprep.mubr.f32.mxu0 %v2773_v12 }
 0x23c   : > { %v2088_v55 = vsub.s32 0, %v2087_v54 }
 0x23d   : > { %2254 = vmatmul.mubr.msk.f32.vlgmr.msra.gmra.mrb[34].mxu1 %vm633_vm5, %v3142_v41  ;;  %v1850_v41 = vld [vmem:[#allocation2 + $0x348] sm:$0xff] }
 0x23e   : > { %2274 = vmatmul.mubr.msk.f32.vlgmr.msra.gmra.mrb[8].mxu0 %vm633_vm5, %v3023_v30  ;;  %1065 = vmatprep.mubr.f32.mxu1 %v2773_v12  ;;  %v1729_v30 = vld [vmem:[#allocation2 + $0x310] sm:$0xff]  ;;  %v2515_v28 = vpack.c.bf16 %v1852_v26, %v1850_v41 }
 0x23f   : > { %2506 = vmatpush1.bf16.msra.mxu0 %v2505_v14  ;;  %1693 = vmatprep.mubr.f32.mxu0 %v2773_v12 }
 0x240   : > { %2508 = vmatprep.subr.bf16.mxu0 %v2507_v15 }
 0x241   : > { %2255 = vmatmul.mubr.msk.f32.gmra.mrb[36].mxu1 %vm633_vm5, %v982_v46  ;;  %v1975_v46 = vld [vmem:[#allocation2 + $0x3a0] sm:$0xff] }
 0x242   : > { %2275 = vmatmul.mubr.msk.f32.gmra.mrb[10].mxu0 %vm633_vm5, %v3033_v40  ;;  %1071 = vmatprep.mubr.f32.mxu1 %v2773_v12  ;;  %v1845_v40 = vld [vmem:[#allocation2 + $0x320] sm:$0xff] }
 0x243   : > { %2510 = vmatpush1.bf16.msra.mxu0 %v2509_v7  ;;  %1699 = vmatprep.mubr.f32.mxu0 %v2773_v12  ;;  %v2513_v27 = vpack.c.bf16 %v1847_v25, %v1845_v40 }
 0x244   : > { %1755 = vmatprep.subr.mxu0 %v1730_v18 }
 0x245   : > { %2256 = vmatmul.mubr.msk.f32.gmra.mrb[38].mxu1 %vm633_vm5, %v984_v61 }
 0x246   : > { %2276 = vmatmul.mubr.msk.f32.gmra.mrb[12].mxu0 %vm633_vm5, %v3043_v48  ;;  %1077 = vmatprep.mubr.f32.mxu1 %v2773_v12  ;;  %v1849_v48 = vld [vmem:[#allocation2 + $0x340] sm:$0xff] }
 0x247   : > { %1705 = vmatprep.mubr.f32.mxu0 %v2773_v12  ;;  %1756 = vmatpush1.msra.mxu0 %v1729_v30  ;;  %v2517_v32 = vpack.c.bf16 %v1851_v29, %v1849_v48 }
 0x248   : > { %2512 = vmatprep.subr.bf16.mxu0 %v2511_v24 }
 0x249   : > { %2257 = vmatmul.mubr.msk.f32.gmra.mrb[40].mxu1 %vm633_vm5, %v986_v31 }
 0x24a   : > { %2277 = vmatmul.mubr.msk.f32.gmra.mrb[14].mxu0 %vm633_vm5, %v3049_v58  ;;  %v1853_v58 = vld [vmem:[#allocation2 + $0x360] sm:$0xff] }
 0x24b   : > { %1811 = vmatprep.mubr.f32.mxu0 %v2773_v12 }
 0x24e   : > { %2278 = vmatmul.mubr.msk.f32.vlgmr.msra.gmra.mrb[8].mxu0 %vm633_vm5, %v3056_v10  ;;  %v1969_v10 = vld [vmem:[#allocation2 + $0x370] sm:$0xff] }
 0x24f   : > { %2514 = vmatpush1.bf16.msra.mxu0 %v2513_v27  ;;  %1817 = vmatprep.mubr.f32.mxu0 %v2773_v12 }
 0x250   : > { %2516 = vmatprep.subr.bf16.mxu0 %v2515_v28 }
 0x252   : > { %2279 = vmatmul.mubr.msk.f32.gmra.mrb[10].mxu0 %vm633_vm5, %v3065_v33  ;;  %v2521_v33 = vpack.c.bf16 %v1971_v39, %v1969_v10 }
 0x253   : > { %2518 = vmatpush1.bf16.msra.mxu0 %v2517_v32  ;;  %1823 = vmatprep.mubr.f32.mxu0 %v2773_v12 }
 0x254   : > { %1879 = vmatprep.subr.mxu0 %v1854_v35 }
 0x256   : > { %2280 = vmatmul.mubr.msk.f32.gmra.mrb[12].mxu0 %vm633_vm5, %v3074_v50  ;;  %v2525_v50 = vpack.c.bf16 %v1975_v46, %v1973_v20 }
 0x257   : > { %1829 = vmatprep.mubr.f32.mxu0 %v2773_v12  ;;  %1880 = vmatpush1.msra.mxu0 %v1853_v58 }
 0x258   : > { %2520 = vmatprep.subr.bf16.mxu0 %v2519_v38 }
 0x25a   : > { %2281 = vmatmul.mubr.msk.f32.gmra.mrb[14].mxu0 %vm633_vm5, %v3082_v0  ;;  %v1977_v0 = vld [vmem:[#allocation2 + $0x3b0] sm:$0xff] }
 0x25b   : > { %1935 = vmatprep.mubr.f32.mxu0 %v2773_v12 }
 0x25e   : > { %2282 = vmatmul.mubr.msk.f32.vlgmr.msra.gmra.mrb[8].mxu0 %vm633_vm5, %v3094_v22 }
 0x25f   : > { %2522 = vmatpush1.bf16.msra.mxu0 %v2521_v33  ;;  %1941 = vmatprep.mubr.f32.mxu0 %v2773_v12 }
 0x260   : > { %2524 = vmatprep.subr.bf16.mxu0 %v2523_v45 }
 0x262   : > { %2283 = vmatmul.mubr.msk.f32.gmra.mrb[10].mxu0 %vm633_vm5, %v3106_v43 }
 0x263   : > { %2526 = vmatpush1.bf16.msra.mxu0 %v2525_v50  ;;  %1947 = vmatprep.mubr.f32.mxu0 %v2773_v12 }
 0x264   : > { %1995 = vmatprep.subr.mxu0 %v1978_v49 }
 0x266   : > { %2284 = vmatmul.mubr.msk.f32.gmra.mrb[12].mxu0 %vm633_vm5, %v3118_v59 }
 0x267   : > { %1953 = vmatprep.mubr.f32.mxu0 %v2773_v12  ;;  %1996 = vmatpush1.msra.mxu0 %v1977_v0 }
 0x26a   : > { %2285 = vmatmul.mubr.msk.f32.gmra.mrb[14].mxu0 %vm633_vm5, %v3130_v8 }
 0x26b   : > { %2051 = vmatprep.mubr.f32.mxu0 %v2773_v12 }
 0x26e   : > { %2286 = vmatmul.mubr.msk.f32.vlgmr.msra.gmra.mrb[8].mxu0 %vm633_vm5, %v3132_v9 }
 0x26f   : > { %2057 = vmatprep.mubr.f32.mxu0 %v2773_v12 }
 0x272   : > { %2287 = vmatmul.mubr.msk.f32.gmra.mrb[10].mxu0 %vm633_vm5, %v3145_v34 }
 0x273   : > { %2063 = vmatprep.mubr.f32.mxu0 %v2773_v12 }
 0x276   : > { %2288 = vmatmul.mubr.msk.f32.gmra.mrb[12].mxu0 %vm633_vm5, %v3156_v47  ;;  %v2084_v47 = vld [vmem:[%s3310_s4] sm:$0x3] }
 0x277   : > { %2069 = vmatprep.mubr.f32.mxu0 %v2773_v12  ;;  %v2092_v12 = vsub.s32 1, %v2087_v54  ;;  %v2089_v56 = vrot.slane %v2084_v47, %v2088_v55 }
 0x279   : > { %v2093_v42 = vrot.slane %v2084_v47, %v2092_v12 }
 0x27a   : > { %2289 = vmatmul.mubr.msk.f32.gmra.mrb[14].mxu0 %vm633_vm5, %v3167_v62 }
 0x310   : > { %v1061_v22 = vpop.f32.mrb[34].mxu1 }
 0x311   : > { %v1063_v43 = vpop.f32.mrb[35].mxu1 }
 0x314   : > { %v1067_v59 = vpop.f32.mrb[36].mxu1 }
 0x315   : > { %v1069_v8 = vpop.f32.mrb[37].mxu1 }
 0x318   : > { %v1073_v9 = vpop.f32.mrb[38].mxu1 }
 0x319   : > { %v1075_v51 = vpop.f32.mrb[39].mxu1 }
 0x31c   : > { %v1079_v52 = vpop.f32.mrb[40].mxu1 }
 0x31d   : > { %v1081_v34 = vpop.f32.mrb[41].mxu1 }
 0x341   : > { %v2053_v19 = vpop.f32.mrb[8].mxu0 }
 0x342   : > { %v2527_v60 = vadd.f32 %v2053_v19, %v1061_v22  ;;  %v2055_v61 = vpop.f32.mrb[9].mxu0 }
 0x343   : > { %v2528_v62 = vadd.f32 %v2055_v61, %v1063_v43 }
 0x344   : > { %v2096_v63 = vadd.f32 %v2527_v60, %v2089_v56 }
 0x345   : > { %v2097_v1 = vadd.f32 %v2528_v62, %v2093_v42  ;;  %v2059_v2 = vpop.f32.mrb[10].mxu0 }
 0x346   : > { %v2104_v3 = vmax.f32 %v2096_v63, 0.0  ;;  %v2529_v4 = vadd.f32 %v2059_v2, %v1067_v59  ;;  %v2061_v5 = vpop.f32.mrb[11].mxu0 }
 0x347   : > { %v2105_v57 = vmax.f32 %v2097_v1, 0.0  ;;  %v2530_v31 = vadd.f32 %v2061_v5, %v1069_v8 }
 0x348   : > { %2112 = vst [vmem:[%s3244_s26] sm:$0xff] %v2104_v3  ;;  %v2098_v6 = vadd.f32 %v2529_v4, %v2089_v56 }
 0x349   : > { %2113 = vst [vmem:[%s3244_s26 + $0x8] sm:$0xff] %v2105_v57  ;;  %v2099_v11 = vadd.f32 %v2530_v31, %v2093_v42  ;;  %v2065_v14 = vpop.f32.mrb[12].mxu0 }
 0x34a   : > { %v2106_v15 = vmax.f32 %v2098_v6, 0.0  ;;  %v2531_v16 = vadd.f32 %v2065_v14, %v1073_v9  ;;  %v2067_v17 = vpop.f32.mrb[13].mxu0 }
 0x34b   : > { %v2107_v7 = vmax.f32 %v2099_v11, 0.0  ;;  %v2532_v18 = vadd.f32 %v2067_v17, %v1075_v51 }
 0x34c   : > { %2114 = vst [vmem:[%s3244_s26 + $0x10] sm:$0xff] %v2106_v15  ;;  %v2100_v21 = vadd.f32 %v2531_v16, %v2089_v56 }
 0x34d   : > { %2115 = vst [vmem:[%s3244_s26 + $0x18] sm:$0xff] %v2107_v7  ;;  %v2101_v23 = vadd.f32 %v2532_v18, %v2093_v42  ;;  %v2071_v30 = vpop.f32.mrb[14].mxu0 }
 0x34e   : > { %v2108_v24 = vmax.f32 %v2100_v21, 0.0  ;;  %v2533_v40 = vadd.f32 %v2071_v30, %v1079_v52  ;;  %v2073_v25 = vpop.f32.mrb[15].mxu0 }
 0x34f   : > { %v2109_v41 = vmax.f32 %v2101_v23, 0.0  ;;  %v2534_v26 = vadd.f32 %v2073_v25, %v1081_v34 }
 0x350   : > { %2116 = vst [vmem:[%s3244_s26 + $0x20] sm:$0xff] %v2108_v24  ;;  %v2102_v27 = vadd.f32 %v2533_v40, %v2089_v56 }
 0x351   : > { %2117 = vst [vmem:[%s3244_s26 + $0x28] sm:$0xff] %v2109_v41  ;;  %v2103_v28 = vadd.f32 %v2534_v26, %v2093_v42 }
 0x352   : > { %v2110_v48 = vmax.f32 %v2102_v27, 0.0 }
 0x353   : > { %v2111_v29 = vmax.f32 %v2103_v28, 0.0 }
 0x354   : > { %2118 = vst [vmem:[%s3244_s26 + $0x30] sm:$0xff] %v2110_v48 }
 0x355   : > { %2119 = vst [vmem:[%s3244_s26 + $0x38] sm:$0xff] %v2111_v29 }
 0x356   : > { %2713 = shalt.err (!%p2710_p7)
}
 0x357   : > { %s2714_s14 = scalar_lea.hbm %s3259_s11, 1024  ;;  %s2718_s17 = scalar_lea.hbm %s3311_s5, 2048 }
 0x358   : > { %p2715_p8 = scmp.ne.s32.totalorder %s3259_s11, %s2714_s14  ;;  %p2719_p1 = scmp.lt.u32.totalorder %s3259_s11, %s3311_s5 }
 0x359   : > { %p2720_p0 = scmp.lt.u32.totalorder %s2718_s17, %s2714_s14  ;;  %p2722_p6 = scmp.lt.u32.totalorder %s2714_s14, %s3259_s11 }
 0x35a   : > { %p2716_p11 = pnand %p2715_p8, %p3322_p9 }
 0x35b   : > { %p2721_p5 = por %p2720_p0, %p2719_p1 }
 0x35c   : > { %p2717_p13 = pneg %p2716_p11 }
 0x35d   : > { %p2723_p10 = por %p2722_p6, %p2721_p5 }
 0x35f   : > { %p2724_p12 = pnand %p2723_p10, %p2717_p13 }
 0x361   : > { %2727 = shalt.err (!%p2724_p12)
}
 0x362   : > { %s2775_s26 = smov 256   ;;  %s2776_s9 = smov 16  }
 0x363   : > { %2619 = dma.vmem_to_hbm [thread:$0]  (%p3322_p9), %s3254_s6, 1024, %s3259_s11, %s3265_s22, %s2775_s26, %s2775_s26, %s2776_s9  }
 0x364 PF: > { %p2631_p2 = scmp.ge.s32.totalorder %s2766_s21, 2  ;;  %s2149_s10 = sand.u32 1, %s2754_s18  }
 0x365   : > { %p3323_p3 = scmp.ne.s32.totalorder %s3316_s29, 0  ;;  %s2150_s8 = scalar_lea.sflag [#allocation4], %s2149_s10 }
 0x367   : > { %p2626_p4 = pnand %p2631_p2, %p3323_p3 }
 0x369   : > { %2749 = dma.done.wait (!%p2626_p4), %s2150_s8, 1024  }
 0x36a   : > { %2751 = vsyncadd (!%p2626_p4), %s2150_s8, 4294966272  ;;  %p16_p7 = scmp.ge.s32.totalorder %s2832_s24, 4   ;;  %s3324_s18 = smov %s2758_s19 }
 0x36b   : > { %s3325_s19 = smov %s2762_s20  ;;  %s3326_s20 = smov %s2843_s27 }
 0x36c   : > { %s3327_s21 = smov %s2832_s24  ;;  %18 = sbr.rel (!%p16_p7) target bundleno = 4 (0x4), region = 91 }
 0x373   :  { %2155 = vsyncpa [#allocation3], 1 }
 0x374   :  { %2157 = vsyncpa [#allocation3 + $0x1], 1 }
 0x375   :  { %2158 = vsyncpa [#allocation4], 1 }
 0x376   :  { %2160 = vsyncpa [#allocation4 + $0x1], 1 }

</bundles_post_ra>
